<compile_context>
chip_gen: v7x
topology: tpu7x:2x2x1
jax: 0.10.0
libtpu: 0.0.40
codegen_flags: <defaults>
</compile_context>

<pallas_src>
import math
from functools import partial

import jax
import jax.numpy as jnp
from jax import lax
from jax.experimental import pallas as pl
from jax.experimental.pallas import tpu as pltpu


# ----------------------------------------------------------------------------
# Fused cross-attention kernel: one grid step = one batch element, all heads.
# ----------------------------------------------------------------------------
def _cross_attention_kernel(x_ref, kv_ref, wq_ref, wkv_ref, o_ref, *,
                            num_heads, dim_heads, scale):
    h, e = num_heads, dim_heads
    dh = h * e

    x = x_ref[0]        # (tq, d_q)
    kvx = kv_ref[0]     # (tk, d_kv)

    # Projections on the MXU with f32 accumulation; fold 1/sqrt(e) into q
    # (multiply on the small (tq, h*e) tile instead of every (tq, tk) dots).
    q = lax.dot_general(x, wq_ref[...], (((1,), (0,)), ((), ())),
                        preferred_element_type=jnp.float32) * scale      # (tq, dh)
    kvp = lax.dot_general(kvx, wkv_ref[...], (((1,), (0,)), ((), ())),
                          preferred_element_type=jnp.float32)            # (tk, 2*dh)

    # Zero-cost in-VMEM split of the fused kv projection.
    k = kvp[:, :dh]     # (tk, dh)
    v = kvp[:, dh:]     # (tk, dh)

    # Per-head attention, statically unrolled (h is small & static).
    outs = []
    for hh in range(h):
        sl = slice(hh * e, (hh + 1) * e)
        qh, kh, vh = q[:, sl], k[:, sl], v[:, sl]            # (tq,e),(tk,e),(tk,e)

        # QK^T without materializing a transpose: contract the last dims.
        dots = lax.dot_general(qh, kh, (((1,), (1,)), ((), ())),
                               preferred_element_type=jnp.float32)  # (tq, tk)
        dots = dots - jnp.max(dots, axis=-1, keepdims=True)
        p = jnp.exp(dots)
        denom = jnp.sum(p, axis=-1, keepdims=True)           # (tq, 1)

        ctx = jnp.dot(p, vh, preferred_element_type=jnp.float32)   # (tq, e)
        # Normalize after P@V (smaller tile than p when tk > e); EUP reciprocal.
        outs.append(ctx * pl.reciprocal(denom, approx=True))

    # Single lane-dense store: heads merged back to (tq, h*e).
    o_ref[0] = jnp.concatenate(outs, axis=-1).astype(o_ref.dtype)


def cross_attention_forward(x, kv, w_q, w_kv, num_heads, dim_heads):
    """x: (b, tq, d_q), kv: (b, tk, d_kv), w_q: (d_q, h*e), w_kv: (d_kv, 2*h*e)."""
    b, tq, d_q = x.shape
    b2, tk, d_kv = kv.shape
    assert b == b2
    dh = num_heads * dim_heads
    assert w_q.shape == (d_q, dh)
    assert w_kv.shape == (d_kv, 2 * dh)
    scale = 1.0 / math.sqrt(float(dim_heads))

    flops = 2 * b * (tq * d_q * dh                # q projection
                     + tk * d_kv * 2 * dh         # kv projection
                     + num_heads * 2 * tq * tk * dim_heads)  # QK^T + P@V
    transcendentals = b * num_heads * tq * tk     # exp
    bytes_accessed = 4 * (x.size + kv.size + w_q.size + w_kv.size + b * tq * dh)

    kernel = partial(_cross_attention_kernel,
                     num_heads=num_heads, dim_heads=dim_heads, scale=scale)

    # TODO(synk): for real atmorep sequence lengths, add a trailing "arbitrary"
    # grid axis over tk with flash-style online softmax (VMEM-bounded on v7x).
    return pl.pallas_call(
        kernel,
        out_shape=jax.ShapeDtypeStruct((b, tq, dh), x.dtype),
        grid=(b,),
        in_specs=[
            pl.BlockSpec((1, tq, d_q), lambda i: (i, 0, 0)),     # x, per batch
            pl.BlockSpec((1, tk, d_kv), lambda i: (i, 0, 0)),    # kv, per batch
            pl.BlockSpec((d_q, dh), lambda i: (0, 0)),           # w_q, resident
            pl.BlockSpec((d_kv, 2 * dh), lambda i: (0, 0)),      # w_kv, resident
        ],
        out_specs=pl.BlockSpec((1, tq, dh), lambda i: (i, 0, 0)),
        compiler_params=pltpu.CompilerParams(
            dimension_semantics=("parallel",),      # 2 TCs on v7x; no-op v5e/v6e
            vmem_limit_bytes=32 * 1024 * 1024,
        ),
        cost_estimate=pl.CostEstimate(
            flops=flops,
            transcendentals=transcendentals,
            bytes_accessed=bytes_accessed,
        ),
    )(x, kv, w_q, w_kv)


# ----------------------------------------------------------------------------
# Module wrapper (parameters + call), mirroring the PyTorch CrossAttention.
# ----------------------------------------------------------------------------
class CrossAttentionPallas:
    def __init__(self, dims_embed, num_heads, dim_heads, key):
        assert len(dims_embed) == 2
        self.num_heads = num_heads
        self.dim_heads = dim_heads
        dim_hidden = num_heads * dim_heads
        k1, k2 = jax.random.split(key)
        bq = 1.0 / math.sqrt(dims_embed[0])
        bk = 1.0 / math.sqrt(dims_embed[1])
        # stored as (in, out) == torch weight.T
        self.w_q = jax.random.uniform(
            k1, (dims_embed[0], dim_hidden), jnp.float32, -bq, bq)
        self.w_kv = jax.random.uniform(
            k2, (dims_embed[1], 2 * dim_hidden), jnp.float32, -bk, bk)

    def __call__(self, x, kv):
        return cross_attention_forward(
            x, kv, self.w_q, self.w_kv, self.num_heads, self.dim_heads)


# ----------------------------------------------------------------------------
# Pure-JAX reference for correctness check.
# ----------------------------------------------------------------------------
def reference_forward(module, x, kv):
    b, tq, _ = x.shape
    _, tk, _ = kv.shape
    h, e = module.num_heads, module.dim_heads
    dh = h * e
    q = x @ module.w_q
    kvp = kv @ module.w_kv
    k, v = kvp[..., :dh], kvp[..., dh:]

    def mh(t_, tlen):
        return t_.reshape(b, tlen, h, e).transpose(0, 2, 1, 3).reshape(b * h, tlen, e)

    q, k, v = mh(q, tq), mh(k, tk), mh(v, tk)
    dots = jnp.einsum("bie,bje->bij", q, k) * (e ** -0.5)
    dots = jax.nn.softmax(dots, axis=-1)
    out = jnp.einsum("bij,bje->bie", dots, v)
    return out.reshape(b, h, tq, e).transpose(0, 2, 1, 3).reshape(b, tq, dh)


if __name__ == "__main__":
    key = jax.random.PRNGKey(0)
    k_param, k_x, k_kv = jax.random.split(key, 3)

    dims_embed = (32, 48)   # (query embed dim, key/value embed dim)
    num_heads = 4
    dim_heads = 16
    b, tq, tk = 2, 8, 16

    module = CrossAttentionPallas(dims_embed, num_heads, dim_heads, k_param)

    x = jax.random.normal(k_x, (b, tq, dims_embed[0]), jnp.float32)
    kv = jax.random.normal(k_kv, (b, tk, dims_embed[1]), jnp.float32)

    out = module(x, kv)
    out = jax.block_until_ready(out)

    ref = reference_forward(module, x, kv)
    assert out.shape == (b, tq, num_heads * dim_heads), out.shape
    # approx=True reciprocal (EUP) -> allow a slightly looser tolerance.
    assert jnp.allclose(out, ref, atol=2e-3, rtol=2e-3), (
        float(jnp.max(jnp.abs(out - ref)))
    )
    print("KERNEL_OK")
</pallas_src>

<mosaic_0001>
module attributes {stable_mosaic.version = 11 : i64} {
  func.func @_cross_attention_kernel(%arg0: i32, %arg1: memref<1x8x32xf32, #tpu.memory_space<vmem>>, %arg2: memref<1x16x48xf32, #tpu.memory_space<vmem>>, %arg3: memref<32x64xf32, #tpu.memory_space<vmem>>, %arg4: memref<48x128xf32, #tpu.memory_space<vmem>>, %arg5: memref<1x8x64xf32, #tpu.memory_space<vmem>>) attributes {dimension_semantics = [#tpu.dimension_semantics<parallel>], iteration_bounds = array<i64: 2>, scalar_prefetch = 0 : i64, scratch_operands = 0 : i64, tpu.core_type = #tpu.core_type<tc>, window_params = [{transform_indices = @transform_0, window_bounds = array<i64: 1, 8, 32>}, {transform_indices = @transform_1, window_bounds = array<i64: 1, 16, 48>}, {pipeline_mode = #tpu.pipeline_mode<synchronous>, transform_indices = @transform_2, window_bounds = array<i64: 32, 64>}, {pipeline_mode = #tpu.pipeline_mode<synchronous>, transform_indices = @transform_3, window_bounds = array<i64: 48, 128>}, {transform_indices = @transform_4, window_bounds = array<i64: 1, 8, 64>}]} {
    %c0 = arith.constant 0 : index
    %c0_0 = arith.constant 0 : index
    %c0_1 = arith.constant 0 : index
    %0 = vector.load %arg1[%c0, %c0_0, %c0_1] : memref<1x8x32xf32, #tpu.memory_space<vmem>>, vector<1x8x32xf32>
    %1 = vector.shape_cast %0 : vector<1x8x32xf32> to vector<8x32xf32>
    %c0_2 = arith.constant 0 : index
    %c0_3 = arith.constant 0 : index
    %c0_4 = arith.constant 0 : index
    %2 = vector.load %arg2[%c0_2, %c0_3, %c0_4] : memref<1x16x48xf32, #tpu.memory_space<vmem>>, vector<1x16x48xf32>
    %3 = vector.shape_cast %2 : vector<1x16x48xf32> to vector<16x48xf32>
    %c0_5 = arith.constant 0 : index
    %c0_6 = arith.constant 0 : index
    %4 = vector.load %arg3[%c0_5, %c0_6] : memref<32x64xf32, #tpu.memory_space<vmem>>, vector<32x64xf32>
    %cst = arith.constant dense<0.000000e+00> : vector<8x64xf32>
    %5 = tpu.matmul %1, %4, %cst {dimension_numbers = #tpu.dot_dimension_numbers<[1], [0], [0], [1], [0, 0, 1, 1], [], []>} : vector<8x32xf32>, vector<32x64xf32>, vector<8x64xf32> -> vector<8x64xf32>
    %cst_7 = arith.constant 2.500000e-01 : f32
    %6 = vector.broadcast %cst_7 : f32 to vector<8x64xf32>
    %7 = arith.mulf %5, %6 : vector<8x64xf32>
    %c0_8 = arith.constant 0 : index
    %c0_9 = arith.constant 0 : index
    %8 = vector.load %arg4[%c0_8, %c0_9] : memref<48x128xf32, #tpu.memory_space<vmem>>, vector<48x128xf32>
    %cst_10 = arith.constant dense<0.000000e+00> : vector<16x128xf32>
    %9 = tpu.matmul %3, %8, %cst_10 {dimension_numbers = #tpu.dot_dimension_numbers<[1], [0], [0], [1], [0, 0, 1, 1], [], []>} : vector<16x48xf32>, vector<48x128xf32>, vector<16x128xf32> -> vector<16x128xf32>
    %10 = vector.extract_strided_slice %9 {offsets = [0, 0], sizes = [16, 64], strides = [1, 1]} : vector<16x128xf32> to vector<16x64xf32>
    %11 = vector.extract_strided_slice %9 {offsets = [0, 64], sizes = [16, 64], strides = [1, 1]} : vector<16x128xf32> to vector<16x64xf32>
    %12 = vector.extract_strided_slice %7 {offsets = [0, 0], sizes = [8, 16], strides = [1, 1]} : vector<8x64xf32> to vector<8x16xf32>
    %13 = vector.extract_strided_slice %10 {offsets = [0, 0], sizes = [16, 16], strides = [1, 1]} : vector<16x64xf32> to vector<16x16xf32>
    %14 = vector.extract_strided_slice %11 {offsets = [0, 0], sizes = [16, 16], strides = [1, 1]} : vector<16x64xf32> to vector<16x16xf32>
    %cst_11 = arith.constant dense<0.000000e+00> : vector<8x16xf32>
    %15 = tpu.matmul %12, %13, %cst_11 {dimension_numbers = #tpu.dot_dimension_numbers<[1], [1], [0], [0], [0, 0, 1, 0], [], []>} : vector<8x16xf32>, vector<16x16xf32>, vector<8x16xf32> -> vector<8x16xf32>
    %cst_12 = arith.constant dense<0xFF800000> : vector<8xf32>
    %16 = vector.multi_reduction <maximumf>, %15, %cst_12 [1] : vector<8x16xf32> to vector<8xf32>
    %17 = vector.shape_cast %16 : vector<8xf32> to vector<8x1xf32>
    %18 = vector.broadcast %17 : vector<8x1xf32> to vector<8x16xf32>
    %19 = arith.subf %15, %18 : vector<8x16xf32>
    %20 = math.exp %19 : vector<8x16xf32>
    %cst_13 = arith.constant dense<0.000000e+00> : vector<8xf32>
    %21 = vector.multi_reduction <add>, %20, %cst_13 [1] : vector<8x16xf32> to vector<8xf32>
    %22 = vector.shape_cast %21 : vector<8xf32> to vector<8x1xf32>
    %cst_14 = arith.constant dense<0.000000e+00> : vector<8x16xf32>
    %23 = tpu.matmul %20, %14, %cst_14 {dimension_numbers = #tpu.dot_dimension_numbers<[1], [0], [0], [1], [0, 0, 1, 1], [], []>} : vector<8x16xf32>, vector<16x16xf32>, vector<8x16xf32> -> vector<8x16xf32>
    %24 = tpu.reciprocal %22 {approx = true} : vector<8x1xf32> -> vector<8x1xf32>
    %25 = vector.broadcast %24 : vector<8x1xf32> to vector<8x16xf32>
    %26 = arith.mulf %23, %25 : vector<8x16xf32>
    %27 = vector.extract_strided_slice %7 {offsets = [0, 16], sizes = [8, 16], strides = [1, 1]} : vector<8x64xf32> to vector<8x16xf32>
    %28 = vector.extract_strided_slice %10 {offsets = [0, 16], sizes = [16, 16], strides = [1, 1]} : vector<16x64xf32> to vector<16x16xf32>
    %29 = vector.extract_strided_slice %11 {offsets = [0, 16], sizes = [16, 16], strides = [1, 1]} : vector<16x64xf32> to vector<16x16xf32>
    %cst_15 = arith.constant dense<0.000000e+00> : vector<8x16xf32>
    %30 = tpu.matmul %27, %28, %cst_15 {dimension_numbers = #tpu.dot_dimension_numbers<[1], [1], [0], [0], [0, 0, 1, 0], [], []>} : vector<8x16xf32>, vector<16x16xf32>, vector<8x16xf32> -> vector<8x16xf32>
    %cst_16 = arith.constant dense<0xFF800000> : vector<8xf32>
    %31 = vector.multi_reduction <maximumf>, %30, %cst_16 [1] : vector<8x16xf32> to vector<8xf32>
    %32 = vector.shape_cast %31 : vector<8xf32> to vector<8x1xf32>
    %33 = vector.broadcast %32 : vector<8x1xf32> to vector<8x16xf32>
    %34 = arith.subf %30, %33 : vector<8x16xf32>
    %35 = math.exp %34 : vector<8x16xf32>
    %cst_17 = arith.constant dense<0.000000e+00> : vector<8xf32>
    %36 = vector.multi_reduction <add>, %35, %cst_17 [1] : vector<8x16xf32> to vector<8xf32>
    %37 = vector.shape_cast %36 : vector<8xf32> to vector<8x1xf32>
    %cst_18 = arith.constant dense<0.000000e+00> : vector<8x16xf32>
    %38 = tpu.matmul %35, %29, %cst_18 {dimension_numbers = #tpu.dot_dimension_numbers<[1], [0], [0], [1], [0, 0, 1, 1], [], []>} : vector<8x16xf32>, vector<16x16xf32>, vector<8x16xf32> -> vector<8x16xf32>
    %39 = tpu.reciprocal %37 {approx = true} : vector<8x1xf32> -> vector<8x1xf32>
    %40 = vector.broadcast %39 : vector<8x1xf32> to vector<8x16xf32>
    %41 = arith.mulf %38, %40 : vector<8x16xf32>
    %42 = vector.extract_strided_slice %7 {offsets = [0, 32], sizes = [8, 16], strides = [1, 1]} : vector<8x64xf32> to vector<8x16xf32>
    %43 = vector.extract_strided_slice %10 {offsets = [0, 32], sizes = [16, 16], strides = [1, 1]} : vector<16x64xf32> to vector<16x16xf32>
    %44 = vector.extract_strided_slice %11 {offsets = [0, 32], sizes = [16, 16], strides = [1, 1]} : vector<16x64xf32> to vector<16x16xf32>
    %cst_19 = arith.constant dense<0.000000e+00> : vector<8x16xf32>
    %45 = tpu.matmul %42, %43, %cst_19 {dimension_numbers = #tpu.dot_dimension_numbers<[1], [1], [0], [0], [0, 0, 1, 0], [], []>} : vector<8x16xf32>, vector<16x16xf32>, vector<8x16xf32> -> vector<8x16xf32>
    %cst_20 = arith.constant dense<0xFF800000> : vector<8xf32>
    %46 = vector.multi_reduction <maximumf>, %45, %cst_20 [1] : vector<8x16xf32> to vector<8xf32>
    %47 = vector.shape_cast %46 : vector<8xf32> to vector<8x1xf32>
    %48 = vector.broadcast %47 : vector<8x1xf32> to vector<8x16xf32>
    %49 = arith.subf %45, %48 : vector<8x16xf32>
    %50 = math.exp %49 : vector<8x16xf32>
    %cst_21 = arith.constant dense<0.000000e+00> : vector<8xf32>
    %51 = vector.multi_reduction <add>, %50, %cst_21 [1] : vector<8x16xf32> to vector<8xf32>
    %52 = vector.shape_cast %51 : vector<8xf32> to vector<8x1xf32>
    %cst_22 = arith.constant dense<0.000000e+00> : vector<8x16xf32>
    %53 = tpu.matmul %50, %44, %cst_22 {dimension_numbers = #tpu.dot_dimension_numbers<[1], [0], [0], [1], [0, 0, 1, 1], [], []>} : vector<8x16xf32>, vector<16x16xf32>, vector<8x16xf32> -> vector<8x16xf32>
    %54 = tpu.reciprocal %52 {approx = true} : vector<8x1xf32> -> vector<8x1xf32>
    %55 = vector.broadcast %54 : vector<8x1xf32> to vector<8x16xf32>
    %56 = arith.mulf %53, %55 : vector<8x16xf32>
    %57 = vector.extract_strided_slice %7 {offsets = [0, 48], sizes = [8, 16], strides = [1, 1]} : vector<8x64xf32> to vector<8x16xf32>
    %58 = vector.extract_strided_slice %10 {offsets = [0, 48], sizes = [16, 16], strides = [1, 1]} : vector<16x64xf32> to vector<16x16xf32>
    %59 = vector.extract_strided_slice %11 {offsets = [0, 48], sizes = [16, 16], strides = [1, 1]} : vector<16x64xf32> to vector<16x16xf32>
    %cst_23 = arith.constant dense<0.000000e+00> : vector<8x16xf32>
    %60 = tpu.matmul %57, %58, %cst_23 {dimension_numbers = #tpu.dot_dimension_numbers<[1], [1], [0], [0], [0, 0, 1, 0], [], []>} : vector<8x16xf32>, vector<16x16xf32>, vector<8x16xf32> -> vector<8x16xf32>
    %cst_24 = arith.constant dense<0xFF800000> : vector<8xf32>
    %61 = vector.multi_reduction <maximumf>, %60, %cst_24 [1] : vector<8x16xf32> to vector<8xf32>
    %62 = vector.shape_cast %61 : vector<8xf32> to vector<8x1xf32>
    %63 = vector.broadcast %62 : vector<8x1xf32> to vector<8x16xf32>
    %64 = arith.subf %60, %63 : vector<8x16xf32>
    %65 = math.exp %64 : vector<8x16xf32>
    %cst_25 = arith.constant dense<0.000000e+00> : vector<8xf32>
    %66 = vector.multi_reduction <add>, %65, %cst_25 [1] : vector<8x16xf32> to vector<8xf32>
    %67 = vector.shape_cast %66 : vector<8xf32> to vector<8x1xf32>
    %cst_26 = arith.constant dense<0.000000e+00> : vector<8x16xf32>
    %68 = tpu.matmul %65, %59, %cst_26 {dimension_numbers = #tpu.dot_dimension_numbers<[1], [0], [0], [1], [0, 0, 1, 1], [], []>} : vector<8x16xf32>, vector<16x16xf32>, vector<8x16xf32> -> vector<8x16xf32>
    %69 = tpu.reciprocal %67 {approx = true} : vector<8x1xf32> -> vector<8x1xf32>
    %70 = vector.broadcast %69 : vector<8x1xf32> to vector<8x16xf32>
    %71 = arith.mulf %68, %70 : vector<8x16xf32>
    %72 = tpu.concatenate %26, %41, %56, %71 in 1 : vector<8x16xf32>, vector<8x16xf32>, vector<8x16xf32>, vector<8x16xf32> -> vector<8x64xf32>
    %c0_27 = arith.constant 0 : index
    %c0_28 = arith.constant 0 : index
    %c0_29 = arith.constant 0 : index
    %73 = vector.load %arg5[%c0_27, %c0_28, %c0_29] : memref<1x8x64xf32, #tpu.memory_space<vmem>>, vector<1x8x64xf32>
    %74 = vector.shape_cast %73 : vector<1x8x64xf32> to vector<8x64xf32>
    %75 = vector.shape_cast %72 : vector<8x64xf32> to vector<1x8x64xf32>
    tpu.vector_store %arg5[%c0_27, %c0_28, %c0_29], %75 {strides = array<i32>} : memref<1x8x64xf32, #tpu.memory_space<vmem>>, vector<1x8x64xf32>,
    return
  }
  func.func @transform_0(%arg0: i32) -> (i32, i32, i32) {
    %c0_i32 = arith.constant 0 : i32
    %c0_i32_0 = arith.constant 0 : i32
    %c0_i32_1 = arith.constant 0 : i32
    return %arg0, %c0_i32, %c0_i32_0 : i32, i32, i32
  }
  func.func @transform_1(%arg0: i32) -> (i32, i32, i32) {
    %c0_i32 = arith.constant 0 : i32
    %c0_i32_0 = arith.constant 0 : i32
    %c0_i32_1 = arith.constant 0 : i32
    return %arg0, %c0_i32, %c0_i32_0 : i32, i32, i32
  }
  func.func @transform_2(%arg0: i32) -> (i32, i32) {
    %c0_i32 = arith.constant 0 : i32
    %c0_i32_0 = arith.constant 0 : i32
    %c0_i32_1 = arith.constant 0 : i32
    return %c0_i32, %c0_i32_0 : i32, i32
  }
  func.func @transform_3(%arg0: i32) -> (i32, i32) {
    %c0_i32 = arith.constant 0 : i32
    %c0_i32_0 = arith.constant 0 : i32
    %c0_i32_1 = arith.constant 0 : i32
    return %c0_i32, %c0_i32_0 : i32, i32
  }
  func.func @transform_4(%arg0: i32) -> (i32, i32, i32) {
    %c0_i32 = arith.constant 0 : i32
    %c0_i32_0 = arith.constant 0 : i32
    %c0_i32_1 = arith.constant 0 : i32
    return %arg0, %c0_i32, %c0_i32_0 : i32, i32, i32
  }
}

</mosaic_0001>

<bundles_post_ra>
// kernel: tpu_custom_call.1
= control target key start
LH: loop header
LB: loop body
LE: loop exit
PB: predicated region body
PF: predicated region fallthrough
CT: control target
= control target key end

     0   :  { %9 = vsyncpa [#allocation3], 0  ;;  %s2248_s0 = inlined_call_operand.hbm [shape: f32[2,8,32], index: 0, kind: input, shape index: {}]   ;;  %s2249_s1 = inlined_call_operand.hbm [shape: f32[2,16,48], index: 1, kind: input, shape index: {}]   ;;  %s2250_s2 = inlined_call_operand.hbm [shape: f32[32,64], index: 2, kind: input, shape index: {}]   ;;  %s2251_s3 = inlined_call_operand.hbm [shape: f32[48,128], index: 3, kind: input, shape index: {}]   ;;  %s2252_s4 = inlined_call_operand.hbm [shape: f32[2,8,64], index: 4, kind: output, shape index: {}]  }
   0x1   :  { %11 = vsyncpa [#allocation3 + $0x1], 0 }
   0x2   :  { %12 = vsyncpa [#allocation6], 0 }
   0x3   :  { %14 = vsyncpa [#allocation6 + $0x1], 0 }
   0x4   :  { %15 = vsyncpa [#allocation9], 0 }
   0x5   :  { %16 = vsyncpa [#allocation4], 0 }
   0x6   :  { %18 = vsyncpa [#allocation4 + $0x1], 0  ;;  %s1859_s15 = smov 0   ;;  %s1861_s16 = smov 0  }
   0x7   :  { %s1863_s17 = smov 0   ;;  %s1865_s18 = smov 0  }
   0x8 LB: > { %s1880_s19 = sadd.s32 4294967295, %s1815_s18   ;;  %s1281_s20 = sadd.s32 4294967294, %s1815_s18   ;;  %s1815_s18 = sphi %s1865_s18, %s2280_s18   ;;  %s1811_s17 = sphi %s1863_s17, %s2279_s17   ;;  %s1807_s16 = sphi %s1861_s16, %s2278_s16   ;;  %s1803_s15 = sphi %s1859_s15, %s2277_s15  }
   0x9   : > { %p44_p0 = scmp.ne.s32.totalorder %s1807_s16, %s1803_s15  ;;  %p2253_p1 = scmp.eq.s32.totalorder %s1880_s19, 0 }
   0xa   : > { %p142_p3 = scmp.eq.s32.totalorder %s1281_s20, 1  ;;  %p1282_p5 = scmp.ge.s32.totalorder %s1815_s18, 1 }
   0xb   : > { %p1889_p4 = por %p2253_p1, %p44_p0  ;;  %p149_p7 = scmp.lt.s32.totalorder %s1815_s18, 3 }
   0xc   : > { %p1894_p6 = por %p142_p3, %p44_p0  ;;  %s1817_s24 = smov [#allocation7]  }
   0xd   : > { %s2258_s21 = scalar_select %p1889_p4, 1, 0 }
   0xe   : > { %s2259_s22 = scalar_select %p1894_p6, 1, 0 }
   0xf   : > { %p1899_p8 = pnand %p1282_p5, %p149_p7  ;;  %s161_s25 = sshll.u32 %s1817_s24, 4  ;;  %s1903_s25 = int_to_ptr.vmem [resolvable:$true] %s161_s25 }
  0x10   : > { %s1818_s27 = smov [#allocation8]   ;;  %s1621_s5 = scalar_lea.hbm %s2250_s2, 512 }
  0x11   : > { %p1500_p9 = pneg %p1899_p8  ;;  %s174_s28 = sshll.u32 %s1818_s27, 4  ;;  %s1914_s28 = int_to_ptr.vmem [resolvable:$true] %s174_s28 }
  0x12   : > { %p1622_p12 = scmp.ne.s32.totalorder %s2250_s2, %s1621_s5  ;;  %p1628_p5 = scmp.lt.u32.totalorder %s1621_s5, %s2250_s2 }
  0x13   : > { %p1910_p11 = pnand %p1500_p9, %p2253_p1 }
  0x15   : > { %p1623_p13 = pneg %p1910_p11 }
  0x17   : > { %p1624_p0 = pnand %p1623_p13, %p1622_p12 }
  0x19   : > { %p1625_p3 = pneg %p1624_p0 }
  0x1b   : > { %p1630_p7 = pnand %p1628_p5, %p1625_p3 }
  0x1d   : > { %1633 = shalt.err (!%p1630_p7)
}
  0x1e   : > { %s1634_s10 = scalar_lea.vmem %s1903_s25, 512  ;;  %p1642_p2 = scmp.lt.s32.totalorder %s1903_s25, %s1903_s25 }
  0x1f   : > { %p1635_p9 = scmp.ne.s32.totalorder %s1903_s25, %s1634_s10  ;;  %p1643_p12 = scmp.lt.s32.totalorder %s1634_s10, %s1634_s10 }
  0x21   : > { %p1637_p10 = pnand %p1635_p9, %p1623_p13  ;;  %p1644_p0 = por %p1643_p12, %p1642_p2 }
  0x23   : > { %p1638_p1 = pneg %p1637_p10 }
  0x25   : > { %p1645_p6 = pnand %p1644_p0, %p1638_p1 }
  0x27   : > { %1648 = shalt.err (!%p1645_p6)
}
  0x28   : > { %s2254_s11 = smov 128   ;;  %s2257_s12 = smov 8  }
  0x29   : > { %1503 = dma.hbm_to_vmem [thread:$0]  (!%p1910_p11), %s2250_s2, 512, %s1903_s25, [#allocation6], %s2254_s11, %s2254_s11, %s2257_s12  }
  0x2a   : > { %s1649_s27 = scalar_lea.hbm %s2251_s3, 768 }
  0x2b   : > { %p1650_p1 = scmp.ne.s32.totalorder %s2251_s3, %s1649_s27  ;;  %p1656_p10 = scmp.lt.u32.totalorder %s1649_s27, %s2251_s3 }
  0x2d   : > { %p1652_p2 = pnand %p1650_p1, %p1623_p13 }
  0x2f   : > { %p1653_p6 = pneg %p1652_p2 }
  0x31   : > { %p1658_p3 = pnand %p1656_p10, %p1653_p6 }
  0x33   : > { %1661 = shalt.err (!%p1658_p3)
}
  0x34   : > { %s1662_s25 = scalar_lea.vmem %s1914_s28, 768  ;;  %p1670_p12 = scmp.lt.s32.totalorder %s1914_s28, %s1914_s28 }
  0x35   : > { %p1663_p5 = scmp.ne.s32.totalorder %s1914_s28, %s1662_s25  ;;  %p1671_p0 = scmp.lt.s32.totalorder %s1662_s25, %s1662_s25 }
  0x37   : > { %p1665_p7 = pnand %p1663_p5, %p1623_p13  ;;  %p1672_p1 = por %p1671_p0, %p1670_p12 }
  0x39   : > { %p1666_p9 = pneg %p1665_p7 }
  0x3b   : > { %p1673_p2 = pnand %p1672_p1, %p1666_p9 }
  0x3d   : > { %1676 = shalt.err (!%p1673_p2)
}
  0x3e   : > { %1506 = dma.hbm_to_vmem [thread:$0]  (!%p1910_p11), %s2251_s3, 768, %s1914_s28, [#allocation9], %s2254_s11, %s2254_s11, %s2257_s12  }
  0x3f   : > { %s1975_s26 = sadd.s32 1, %s1815_s18   ;;  %s31_s9 = sadd.s32 1, %s1811_s17 }
  0x40   : > { %s28_s10 = ssub.s32 %s1815_s18, %s1975_s26  ;;  %p38_p13 = scmp.ne.s32.totalorder %s1811_s17, %s1807_s16 }
  0x41   : > { %p29_p6 = scmp.eq.s32.totalorder %s28_s10, 0  ;;  %p39_p10 = scmp.eq.s32.totalorder %s1815_s18, 0 }
  0x42   : > { %p2262_p3 = scmp.eq.s32.totalorder %s1880_s19, 1  ;;  %p1520_p7 = scmp.lt.s32.totalorder %s1815_s18, 2 }
  0x43   : > { %s1991_s14 = scalar_select %p29_p6, %s1811_s17, %s31_s9  }
  0x44   : > { %p1985_p5 = por %p2262_p3, %p38_p13  ;;  %p40_p9 = por %p39_p10, %p38_p13 }
  0x45   : > { %s1994_s20 = sand.u32 1, %s1811_s17   ;;  %s1287_s24 = sshll.u32 %s1815_s18, 7 }
  0x46   : > { %s2263_s13 = scalar_select %p1985_p5, 1, 0 }
  0x47   : > { %s1286_s28 = sshll.u32 %s1994_s20, 3  ;;  %s2001_s30 = scalar_lea.hbm %s2248_s0, %s1287_s24 }
  0x48   : > { %s192_s5 = scalar_lea.vmem [#allocation2], %s1286_s28  ;;  %p2005_p11 = pnand %p1520_p7, %p40_p9 }
  0x49   : > { %s199_s6 = sshll.u32 %s192_s5, 4  ;;  %s1288_s7 = sshll.u32 %s1994_s20, 4  ;;  %s2003_s6 = int_to_ptr.vmem [resolvable:$true] %s199_s6 }
  0x4a   : > { %s206_s8 = sand.u32 1, %s1815_s18   ;;  %s189_s9 = scalar_lea.sflag [#allocation3], %s1994_s20 }
  0x4b   : > { %s1677_s10 = scalar_lea.hbm %s2001_s30, 128  ;;  %p1679_p0 = pneg %p2005_p11 }
  0x4c   : > { %p1678_p12 = scmp.ne.s32.totalorder %s2001_s30, %s1677_s10  ;;  %s1682_s27 = scalar_lea.hbm %s2248_s0, 256 }
  0x4d   : > { %p1683_p13 = scmp.lt.u32.totalorder %s2001_s30, %s2248_s0  ;;  %p1684_p6 = scmp.lt.u32.totalorder %s1682_s27, %s1677_s10 }
  0x4e   : > { %p1680_p1 = pnand %p1679_p0, %p1678_p12  ;;  %p1686_p3 = scmp.lt.u32.totalorder %s1677_s10, %s2001_s30 }
  0x4f   : > { %p1685_p10 = por %p1684_p6, %p1683_p13 }
  0x50   : > { %p1681_p2 = pneg %p1680_p1 }
  0x51   : > { %p1687_p7 = por %p1686_p3, %p1685_p10 }
  0x53   : > { %p1688_p9 = pnand %p1687_p7, %p1681_p2 }
  0x55   : > { %1691 = shalt.err (!%p1688_p9)
}
  0x56   : > { %s1692_s11 = scalar_lea.vmem %s2003_s6, 128  ;;  %s1821_s28 = smov [#allocation2]  }
  0x57   : > { %p1693_p12 = scmp.ne.s32.totalorder %s2003_s6, %s1692_s11  ;;  %s1697_s24 = sshll.u32 %s1821_s28, 4  ;;  %s1698_s24 = int_to_ptr.vmem [resolvable:$false] %s1697_s24 }
  0x58   : > { %s1699_s29 = scalar_lea.vmem %s1698_s24, 256  ;;  %p1700_p4 = scmp.lt.s32.totalorder %s2003_s6, %s1698_s24 }
  0x59   : > { %p1695_p1 = pnand %p1693_p12, %p1679_p0  ;;  %p1701_p13 = scmp.lt.s32.totalorder %s1699_s29, %s1692_s11 }
  0x5b   : > { %p1696_p5 = pneg %p1695_p1  ;;  %p1702_p6 = por %p1701_p13, %p1700_p4 }
  0x5d   : > { %p1703_p10 = pnand %p1702_p6, %p1696_p5 }
  0x5f   : > { %1706 = shalt.err (!%p1703_p10)
}
  0x60   : > { %1510 = dma.hbm_to_vmem [thread:$0]  (!%p2005_p11), %s2001_s30, 128, %s2003_s6, %s189_s9  }
  0x61   : > { %s210_s10 = scalar_lea.vmem [#allocation5], %s1288_s7  ;;  %s1320_s5 = sshll.u32 %s1815_s18, 8 }
  0x62   : > { %s217_s27 = sshll.u32 %s210_s10, 4  ;;  %s2045_s24 = scalar_lea.hbm %s2249_s1, %s1320_s5  ;;  %s2039_s27 = int_to_ptr.vmem [resolvable:$true] %s217_s27 }
  0x63   : > { %s2049_s29 = scalar_lea.sflag [#allocation6], %s206_s8  ;;  %s1707_s12 = scalar_lea.hbm %s2045_s24, 256 }
  0x64   : > { %p1708_p4 = scmp.ne.s32.totalorder %s2045_s24, %s1707_s12  ;;  %s1712_s6 = scalar_lea.hbm %s2249_s1, 512 }
  0x65   : > { %p1713_p3 = scmp.lt.u32.totalorder %s2045_s24, %s2249_s1  ;;  %p1714_p7 = scmp.lt.u32.totalorder %s1712_s6, %s1707_s12 }
  0x66   : > { %p1710_p5 = pnand %p1708_p4, %p1679_p0  ;;  %p1716_p12 = scmp.lt.u32.totalorder %s1707_s12, %s2045_s24 }
  0x67   : > { %p1715_p9 = por %p1714_p7, %p1713_p3 }
  0x68   : > { %p1711_p2 = pneg %p1710_p5 }
  0x69   : > { %p1717_p1 = por %p1716_p12, %p1715_p9 }
  0x6b   : > { %p1718_p13 = pnand %p1717_p1, %p1711_p2 }
  0x6d   : > { %1721 = shalt.err (!%p1718_p13)
}
  0x6e   : > { %s1722_s8 = scalar_lea.vmem %s2039_s27, 256  ;;  %s1822_s10 = smov [#allocation5]  }
  0x6f   : > { %p1723_p6 = scmp.ne.s32.totalorder %s2039_s27, %s1722_s8  ;;  %s1727_s5 = sshll.u32 %s1822_s10, 4  ;;  %s1728_s5 = int_to_ptr.vmem [resolvable:$false] %s1727_s5 }
  0x70   : > { %s1729_s28 = scalar_lea.vmem %s1728_s5, 512  ;;  %p1730_p5 = scmp.lt.s32.totalorder %s2039_s27, %s1728_s5 }
  0x71   : > { %p1725_p10 = pnand %p1723_p6, %p1679_p0  ;;  %p1731_p3 = scmp.lt.s32.totalorder %s1729_s28, %s1722_s8 }
  0x73   : > { %p1726_p4 = pneg %p1725_p10  ;;  %p1732_p7 = por %p1731_p3, %p1730_p5 }
  0x75   : > { %p1733_p9 = pnand %p1732_p7, %p1726_p4 }
  0x77   : > { %1736 = shalt.err (!%p1733_p9)
}
  0x78   : > { %s2265_s12 = smov 8   ;;  %s2266_s11 = smov 128  }
  0x79   : > { %1513 = dma.hbm_to_vmem [thread:$0]  (!%p2005_p11), %s2045_s24, 256, %s2039_s27, %s2049_s29, %s2266_s11, %s2266_s11, %s2265_s12  }
  0x7a   : > { %229 = sbr.rel (%p1899_p8) target bundleno = 1966 (0x7ae), region = 36  ;;  %s2081_s20 = sand.u32 (!%p1899_p8), 1, %s1807_s16  }
  0x7b   : > { %s1292_s30 = sshll.u32 (!%p1899_p8), %s2081_s20, 3  ;;  %s232_s6 = scalar_lea.sflag (!%p1899_p8), [#allocation3], %s2081_s20 }
  0x7c   : > { %s2087_s25 = scalar_lea.vmem (!%p1899_p8), [#allocation2], %s1292_s30  ;;  %p2267_p0 = scmp.ne.s32.totalorder (!%p1899_p8), %s2258_s21, 0 }
  0x81   : > { %1782 = dma.done.wait (%p2267_p0), %s232_s6, 128  }
  0x82   : > { %1784 = vsyncadd (%p2267_p0), %s232_s6, 4294967168  ;;  %s240_s23 = sand.u32 1, %s1880_s19   ;;  %s1293_s27 = sshll.u32 %s2081_s20, 4 }
  0x83   : > { %s241_s24 = scalar_lea.sflag [#allocation6], %s240_s23  ;;  %s2095_s29 = scalar_lea.vmem [#allocation5], %s1293_s27 }
  0x84   : > { %1786 = dma.done.wait (%p2267_p0), %s241_s24, 256  }
  0x85   : > { %1788 = vsyncadd (%p2267_p0), %s241_s24, 4294967040  ;;  %p2268_p8 = scmp.eq.s32.totalorder %s1880_s19, 0 }
  0x87   : > { %1790 = dma.done.wait (%p2268_p8), [#allocation6], 512   ;;  %p2269_p11 = pmov %p2268_p8 }
  0x88   : > { %p2270_p2 = pmov %p2268_p8 }
  0x89   : > { %1792 = vsyncadd (%p2269_p11), [#allocation6], 4294966784 }
  0x8a   : > { %1794 = dma.done.wait (%p2270_p2), [#allocation9], 768   ;;  %p2271_p12 = pmov %p2270_p2 }
  0x8b   : > { %v1823_v0 = vmov 0.0|0.0   ;;  %vm1824_vm0 = vmmov 0   ;;  %v1825_v1 = vmov 0.0   ;;  %v364_v2 = vld [vmem:[#allocation8] sm:$0xff]  ;;  %v365_v3 = vld [vmem:[#allocation8 + $0x8] sm:$0xff]  ;;  %v366_v4 = vld [vmem:[#allocation8 + $0x10] sm:$0xff] }
  0x8c   : > { %1796 = vsyncadd (%p2271_p12), [#allocation9], 4294966528  ;;  %1440 = vmatprep.subr.bf16.mxu0 %v1823_v0  ;;  %1366 = vmatprep.mubr.msk.f32.mxu0 %vm1824_vm0, %v1825_v1  ;;  %vm370_vm1 = vcmask 392192   ;;  %v1446_v5 = vpack.c.bf16 %v365_v3, %v364_v2  ;;  %v367_v6 = vld [vmem:[#allocation8 + $0x18] sm:$0xff]  ;;  %v368_v7 = vld [vmem:[#allocation8 + $0x20] sm:$0xff]  ;;  %vm289_vm2 = vcmask 261120  }
  0x8d   : > { %v369_v8 = vld [vmem:[#allocation8 + $0x28] sm:$0xff]  ;;  %v1450_v9 = vpack.c.bf16 %v367_v6, %v366_v4  ;;  %v285_v10 = vld [vmem:[#allocation7] sm:$0xff]  ;;  %v287_v14 = vld [vmem:[#allocation7 + $0x10] sm:$0xff]  ;;  %vm452_vm3 = vcmask 130048   ;;  %s1826_s21 = smov 112   ;;  %s1827_s7 = smov 64  }
  0x8e   : > { %v286_v11 = vld [vmem:[#allocation7 + $0x8] sm:$0xff]  ;;  %v283_v12 = vld [vmem:[%s2095_s29] sm:$0xff]  ;;  %1447 = vmatprep.subr.bf16.mxu1 %v1446_v5  ;;  %v288_v15 = vld [vmem:[#allocation7 + $0x18] sm:$0xff]  ;;  %v1454_v16 = vpack.c.bf16 %v369_v8, %v368_v7  ;;  %s1828_s9 = smov 96   ;;  %s1829_s8 = smov 48   ;;  %vm1153_vm5 = vcmask 523264  }
  0x8f   : > { %v1441_v13 = vpack.c.bf16 %v286_v11, %v285_v10  ;;  %1381 = vmatprep.mubr.msk.f32.mxu1 %vm370_vm1, %v283_v12  ;;  %1449 = vmatpush3.bf16.msra.mxu1 %v1446_v5  ;;  %v1444_v17 = vpack.c.bf16 %v288_v15, %v287_v14  ;;  %v282_v18 = vld [vmem:[%s2087_s25] sm:$0xff]  ;;  %vm2127_vm4 = vmpackc.low %vm452_vm3, %vm452_vm3  ;;  %s1830_s10 = smov 32   ;;  %s1831_s5 = smov 80  }
  0x90   : > { %1451 = vmatprep.subr.bf16.mxu1 %v1450_v9  ;;  %v284_v19 = vld [vmem:[%s2095_s29 + $0x8] sm:$0xff]  ;;  %s1832_s28 = smov 16   ;;  %s1317_s12 = sshll.u32 %s1880_s19, 7 }
  0x91   : > { %1442 = vmatpush3.bf16.msra.mxu0 %v1441_v13  ;;  %s281_s11 = scalar_lea.vmem [#allocation10], %s1292_s30  ;;  %s2203_s27 = scalar_lea.hbm %s2252_s4, %s1317_s12 }
  0x92   : > { %1443 = vmatprep.subr.bf16.mxu0 %v1823_v0  ;;  %s1169_s6 = sshll.u32 %s281_s11, 4  ;;  %s1156_s19 = scalar_lea.sflag [#allocation4], %s2081_s20  ;;  %s2205_s6 = int_to_ptr.vmem [resolvable:$true] %s1169_s6 }
  0x93   : > { %1453 = vmatpush3.bf16.msra.mxu1 %v1450_v9  ;;  %s1737_s30 = scalar_lea.vmem %s2205_s6, 128  ;;  %p2274_p13 = scmp.ne.s32.totalorder %s2263_s13, 0 }
  0x94   : > { %1455 = vmatprep.subr.bf16.mxu1 %v1454_v16  ;;  %p1738_p1 = scmp.ne.s32.totalorder %s2205_s6, %s1737_s30  ;;  %s1833_s24 = smov [#allocation10]  }
  0x95   : > { %1445 = vmatpush3.bf16.msra.mxu0 %v1444_v17  ;;  %s1741_s29 = sshll.u32 %s1833_s24, 4  ;;  %s1742_s29 = int_to_ptr.vmem [resolvable:$false] %s1741_s29 }
  0x96   : > { %1458 = vmatprep.subr.bf16.mxu0 %v1823_v0  ;;  %p1739_p6 = pnand %p1738_p1, %p2274_p13  ;;  %p1744_p4 = scmp.lt.s32.totalorder %s2205_s6, %s1742_s29 }
  0x97   : > { %1457 = vmatpush3.bf16.msra.mxu1 %v1454_v16 }
  0x98   : > { %1367 = vmatmul.mubr.msk.f32.vlgmr.msra.gmra.mrb[0].mxu0 %vm289_vm2, %v282_v18  ;;  %1462 = vmatprep.subr.bf16.mxu1 %v1823_v0  ;;  %p1740_p10 = pneg %p1739_p6 }
  0x99   : > { %1388 = vmatprep.mubr.msk.f32.mxu0 %vm1824_vm0, %v1825_v1 }
  0x9a   : > { %1382 = vmatmul.mubr.msk.f32.vlgmr.msra.gmra.mrb[0].mxu1 %vm370_vm1, %v284_v19 }
  0x9b   : > { %1395 = vmatprep.mubr.msk.f32.mxu1 %vm1824_vm0, %v1825_v1 }
 0x16b   : > { %v359_v20 = vpop.f32.mrb[0].mxu0 }
 0x16c   : > { %v1368_v21 = vpop.f32.mrb[1].mxu0  ;;  %v363_v27 = vmul.f32 0.25, %v359_v20 }
 0x16d   : > { %v1383_v22 = vpop.f32.mrb[0].mxu1 }
 0x16e   : > { %v443_v23 = vpop.f32.mrb[1].mxu1 }
 0x16f   : > { %v2131_v25 = vpack.i.bf16 %v1383_v22, %v443_v23  ;;  %v1459_v26 = vpack.c.bf16 %v1383_v22, %v443_v23 }
 0x171   : > { %1571 = vrot.lane.b32.xlu0 %v2131_v25, %s1826_s21  ;;  %1461 = vmatpush3.bf16.xpose.msk.msra.mxu0 %vm2127_vm4, %v1459_v26 }
 0x172   : > { %1465 = vmatprep.subr.bf16.mxu0 %v1823_v0 }
 0x175   : > { %622 = vrot.lane.b32.xlu0 %v363_v27, %s1826_s21  ;;  %s1743_s21 = scalar_lea.vmem %s1742_s29, 256 }
 0x176   : > { %p1745_p5 = scmp.lt.s32.totalorder %s1743_s21, %s1737_s30 }
 0x178   : > { %1389 = vmatmul.mubr.msk.f32.vlgmr.msra.gmra.mrb[2].mxu0 %vm452_vm3, %v363_v27  ;;  %p1746_p3 = por %p1745_p5, %p1744_p4 }
 0x179   : > { %1576 = vrot.lane.b32.xlu0 %v2131_v25, %s1827_s7  ;;  %1402 = vmatprep.mubr.msk.f32.mxu0 %vm1824_vm0, %v1825_v1 }
 0x17a   : > { %p1747_p7 = pnand %p1746_p3, %p1740_p10 }
 0x17d   : > { %1586 = vrot.lane.b32.xlu0 %v2131_v25, %s1828_s9 }
 0x181   : > { %794 = vrot.lane.b32.xlu0 %v363_v27, %s1828_s9 }
 0x1e3   : > { %v1572_v28 = vpop.permute.xlu0 %1571 }
 0x1e4   : > { %v1574_v29 = vunpack.i.h.bf16 %v1572_v28  ;;  %v1573_v30 = vunpack.i.l.bf16 %v1572_v28 }
 0x1e6   : > { %v1466_v31 = vpack.c.bf16 %v1574_v29, %v1573_v30 }
 0x1e7   : > { %v623_v32 = vpop.permute.xlu0 %622 }
 0x1e8   : > { %1468 = vmatpush3.bf16.xpose.msk.msra.mxu0 %vm2127_vm4, %v1466_v31 }
 0x1e9   : > { %1476 = vmatprep.subr.bf16.mxu0 %v1823_v0 }
 0x1eb   : > { %v1577_v33 = vpop.permute.xlu0 %1576 }
 0x1ec   : > { %v1579_v34 = vunpack.i.h.bf16 %v1577_v33  ;;  %v1578_v35 = vunpack.i.l.bf16 %v1577_v33 }
 0x1ee   : > { %v1463_v36 = vpack.c.bf16 %v1579_v34, %v1578_v35 }
 0x1ef   : > { %1403 = vmatmul.mubr.msk.f32.vlgmr.msra.gmra.mrb[4].mxu0 %vm452_vm3, %v623_v32  ;;  %v1587_v55 = vpop.permute.xlu0 %1586 }
 0x1f0   : > { %1464 = vmatpush3.bf16.msra.mxu1 %v1463_v36  ;;  %1423 = vmatprep.mubr.msk.f32.mxu0 %vm1824_vm0, %v1825_v1  ;;  %v1589_v59 = vunpack.i.h.bf16 %v1587_v55  ;;  %v1588_v60 = vunpack.i.l.bf16 %v1587_v55 }
 0x1f1   : > { %1469 = vmatprep.subr.bf16.mxu1 %v1823_v0 }
 0x1f2   : > { %v1473_v62 = vpack.c.bf16 %v1589_v59, %v1588_v60 }
 0x1f3   : > { %v795_v63 = vpop.permute.xlu0 %794 }
 0x24b   : > { %v528_v37 = vpop.f32.mrb[2].mxu0 }
 0x24c   : > { %v532_v38 = vsel %vm452_vm3, %v528_v37, -inf  ;;  %v1390_v39 = vpop.f32.mrb[3].mxu0 }
 0x24d   : > { %533 = vmax.xlane.f32.xlu1 %v532_v38 }
 0x2c2   : > { %v700_v40 = vpop.f32.mrb[4].mxu0 }
 0x2c3   : > { %v1404_v41 = vpop.f32.mrb[5].mxu0  ;;  %v704_v42 = vsel %vm452_vm3, %v700_v40, -inf }
 0x2c4   : > { %705 = vmax.xlane.f32.xlu1 %v704_v42 }
 0x2d5   : > { %1581 = vrot.lane.b32.xlu1 %v2131_v25, %s1829_s8 }
 0x2d9   : > { %1591 = vrot.lane.b32.xlu1 %v2131_v25, %s1830_s10 }
 0x2da   : > { %v534_v43 = vpop.xlane.xlu1 %533 }
 0x2db   : > { %v535_v44 = vsub.f32 %v528_v37, %v534_v43 }
 0x2dd   : > { %v536_v45 = vmul.f32 1.442695, %v535_v44  ;;  %1596 = vrot.lane.b32.xlu1 %v2131_v25, %s1831_s5 }
 0x2df   : > { %1605 = vpow2.f32 %v536_v45 }
 0x2e1   : > { %966 = vrot.lane.b32.xlu1 %v363_v27, %s1831_s5 }
 0x2e9   : > { %v2156_v46 = vpop.eup %1605 }
 0x2ea   : > { %1396 = vmatmul.mubr.msk.f32.vlgmr.msra.gmra.mrb[2].mxu1 %vm452_vm3, %v2156_v46  ;;  %v538_v33 = vsel %vm452_vm3, %v2156_v46, 0.0 }
 0x2eb   : > { %1409 = vmatprep.mubr.msk.f32.mxu1 %vm1824_vm0, %v1825_v1 }
 0x351   : > { %v706_v47 = vpop.xlane.xlu1 %705 }
 0x352   : > { %v707_v48 = vsub.f32 %v700_v40, %v706_v47 }
 0x354   : > { %v708_v49 = vmul.f32 1.442695, %v707_v48 }
 0x355   : > { %v1582_v50 = vpop.permute.xlu1 %1581 }
 0x356   : > { %1607 = vpow2.f32 %v708_v49  ;;  %v1584_v51 = vunpack.i.h.bf16 %v1582_v50  ;;  %v1583_v52 = vunpack.i.l.bf16 %v1582_v50 }
 0x358   : > { %v1470_v53 = vpack.c.bf16 %v1584_v51, %v1583_v52 }
 0x359   : > { %v1592_v54 = vpop.permute.xlu1 %1591 }
 0x35a   : > { %v1594_v56 = vunpack.i.h.bf16 %v1592_v54  ;;  %v1593_v57 = vunpack.i.l.bf16 %v1592_v54  ;;  %1471 = vmatpush3.bf16.msra.mxu1 %v1470_v53 }
 0x35b   : > { %1472 = vmatprep.subr.bf16.mxu1 %v1823_v0 }
 0x35c   : > { %v1477_v58 = vpack.c.bf16 %v1594_v56, %v1593_v57 }
 0x35d   : > { %v1597_v16 = vpop.permute.xlu1 %1596 }
 0x35e   : > { %1478 = vmatpush3.bf16.msra.mxu0 %v1477_v58  ;;  %v1599_v17 = vunpack.i.h.bf16 %v1597_v16  ;;  %v1598_v18 = vunpack.i.l.bf16 %v1597_v16 }
 0x35f   : > { %1479 = vmatprep.subr.bf16.mxu0 %v1823_v0 }
 0x360   : > { %v1608_v61 = vpop.eup %1607  ;;  %v1480_v20 = vpack.c.bf16 %v1599_v17, %v1598_v18 }
 0x361   : > { %1410 = vmatmul.mubr.msk.f32.vlgmr.msra.gmra.mrb[4].mxu1 %vm452_vm3, %v1608_v61  ;;  %v967_v21 = vpop.permute.xlu1 %966 }
 0x362   : > { %1416 = vmatprep.mubr.msk.f32.mxu1 %vm1824_vm0, %v1825_v1 }
 0x363   : > { %1475 = vmatpush3.bf16.xpose.msk.msra.mxu1 %vm2127_vm4, %v1473_v62 }
 0x364   : > { %1483 = vmatprep.subr.bf16.mxu1 %v1823_v0  ;;  %v710_v0 = vsel %vm452_vm3, %v1608_v61, 0.0 }
 0x36a   : > { %1417 = vmatmul.mubr.msk.f32.vlgmr.msra.gmra.mrb[6].mxu1 %vm452_vm3, %v795_v63 }
 0x36b   : > { %1437 = vmatprep.mubr.msk.f32.mxu1 %vm1824_vm0, %v1825_v1 }
 0x3bd   : > { %v2173_v2 = vpop.f32.mrb[2].mxu1 }
 0x3be   : > { %v1397_v3 = vpop.f32.mrb[3].mxu1 }
 0x434   : > { %v788_v4 = vpop.f32.mrb[4].mxu1 }
 0x435   : > { %v1411_v5 = vpop.f32.mrb[5].mxu1 }
 0x43d   : > { %v872_v6 = vpop.f32.mrb[6].mxu1 }
 0x43e   : > { %v1418_v7 = vpop.f32.mrb[7].mxu1  ;;  %v876_v8 = vsel %vm452_vm3, %v872_v6, -inf }
 0x43f   : > { %877 = vmax.xlane.f32.xlu0 %v876_v8 }
 0x455   : > { %1601 = vrot.lane.b32.xlu0 %v2131_v25, %s1832_s28 }
 0x474   : > { %711 = vadd.xlane.f32.xlu0 %v710_v0 }
 0x4cc   : > { %v878_v9 = vpop.xlane.xlu0 %877 }
 0x4cd   : > { %v879_v10 = vsub.f32 %v872_v6, %v878_v9 }
 0x4cf   : > { %v880_v11 = vmul.f32 1.442695, %v879_v10 }
 0x4d0   : > { %v1602_v12 = vpop.permute.xlu0 %1601 }
 0x4d1   : > { %1609 = vpow2.f32 %v880_v11  ;;  %v1604_v13 = vunpack.i.h.bf16 %v1602_v12  ;;  %v1603_v14 = vunpack.i.l.bf16 %v1602_v12 }
 0x4d3   : > { %v1484_v15 = vpack.c.bf16 %v1604_v13, %v1603_v14 }
 0x4d5   : > { %1485 = vmatpush3.bf16.msra.mxu1 %v1484_v15 }
 0x4db   : > { %v1610_v19 = vpop.eup %1609 }
 0x4dc   : > { %1424 = vmatmul.mubr.msk.f32.vlgmr.msra.gmra.mrb[6].mxu0 %vm452_vm3, %v1610_v19  ;;  %v882_v28 = vsel %vm452_vm3, %v1610_v19, 0.0 }
 0x4dd   : > { %1482 = vmatpush3.bf16.xpose.msk.msra.mxu0 %vm2127_vm4, %v1480_v20  ;;  %1430 = vmatprep.mubr.msk.f32.mxu0 %vm1824_vm0, %v1825_v1 }
 0x4e4   : > { %1431 = vmatmul.mubr.msk.f32.vlgmr.msra.gmra.mrb[8].mxu0 %vm452_vm3, %v967_v21 }
 0x501   : > { %v712_v32 = vpop.xlane.xlu0 %711 }
 0x5af   : > { %v960_v22 = vpop.f32.mrb[6].mxu0 }
 0x5b0   : > { %v1425_v23 = vpop.f32.mrb[7].mxu0 }
 0x5b7   : > { %v1044_v25 = vpop.f32.mrb[8].mxu0 }
 0x5b8   : > { %v1432_v26 = vpop.f32.mrb[9].mxu0  ;;  %v1048_v27 = vsel %vm452_vm3, %v1044_v25, -inf }
 0x5b9   : > { %1049 = vmax.xlane.f32.xlu1 %v1048_v27 }
 0x5bd   : > { %883 = vadd.xlane.f32.xlu1 %v882_v28 }
 0x646   : > { %v1050_v29 = vpop.xlane.xlu1 %1049 }
 0x647   : > { %v1051_v30 = vsub.f32 %v1044_v25, %v1050_v29 }
 0x649   : > { %v1052_v24 = vmul.f32 1.442695, %v1051_v30 }
 0x64a   : > { %v884_v34 = vpop.xlane.xlu1 %883 }
 0x64b   : > { %1611 = vpow2.f32 %v1052_v24 }
 0x64c   : > { %1613 = vrcp.f32 %v712_v32 }
 0x64d   : > { %1615 = vrcp.f32 %v884_v34 }
 0x655   : > { %v1612_v31 = vpop.eup %1611 }
 0x656   : > { %1438 = vmatmul.mubr.msk.f32.vlgmr.msra.gmra.mrb[8].mxu1 %vm452_vm3, %v1612_v31  ;;  %v1054_v1 = vsel %vm452_vm3, %v1612_v31, 0.0  ;;  %v1614_v35 = vpop.eup %1613 }
 0x657   : > { %1055 = vadd.xlane.f32.xlu1 %v1054_v1  ;;  %v793_v36 = vmul.f32 %v1614_v35, %v788_v4  ;;  %v1616_v37 = vpop.eup %1615 }
 0x658   : > { %v965_v38 = vmul.f32 %v1616_v37, %v960_v22 }
 0x65b   : > { %539 = vadd.xlane.f32.xlu1 %v538_v33 }
 0x66c   : > { %1139 = vrot.lane.b32.xlu1 %v793_v36, %s1832_s28 }
 0x670   : > { %1143 = vrot.lane.b32.xlu1 %v965_v38, %s1830_s10 }
 0x6e4   : > { %v1056_v39 = vpop.xlane.xlu1 %1055 }
 0x6e5   : > { %1617 = vrcp.f32 %v1056_v39 }
 0x6e8   : > { %v540_v44 = vpop.xlane.xlu1 %539 }
 0x6e9   : > { %1619 = vrcp.f32 %v540_v44 }
 0x6ec   : > { %v1140_v47 = vpop.permute.xlu1 %1139 }
 0x6ef   : > { %v1618_v40 = vpop.eup %1617 }
 0x6f0   : > { %v1144_v49 = vpop.permute.xlu1 %1143 }
 0x6f3   : > { %v1620_v45 = vpop.eup %1619 }
 0x6f4   : > { %v621_v46 = vmul.f32 %v1620_v45, %v2173_v2 }
 0x6f6   : > { %v1150_v48 = vsel %vm452_vm3, %v621_v46, %v1140_v47 }
 0x6f7   : > { %v1151_v50 = vsel %vm289_vm2, %v1150_v48, %v1144_v49 }
 0x729   : > { %v1132_v41 = vpop.f32.mrb[8].mxu1 }
 0x72a   : > { %v1137_v42 = vmul.f32 %v1618_v40, %v1132_v41  ;;  %v1439_v43 = vpop.f32.mrb[9].mxu1 }
 0x72c   : > { %1147 = vrot.lane.b32.xlu0 %v1137_v42, %s1829_s8 }
 0x79e   : > { %v1148_v51 = vpop.permute.xlu0 %1147 }
 0x79f   : > { %v1152_v52 = vsel %vm370_vm1, %v1151_v50, %v1148_v51 }
 0x7a0   : > { %1154 = vst.msk [vmem:[%s281_s11] sm:$0xff] %vm1153_vm5, %v1152_v52 }
 0x7a1   : > { %1750 = shalt.err (!%p1747_p7)
}
 0x7a2   : > { %s1751_s20 = scalar_lea.hbm %s2203_s27, 128  ;;  %s1755_s8 = scalar_lea.hbm %s2252_s4, 256 }
 0x7a3   : > { %p1752_p9 = scmp.ne.s32.totalorder %s2203_s27, %s1751_s20  ;;  %p1756_p11 = scmp.lt.u32.totalorder %s2203_s27, %s2252_s4 }
 0x7a4   : > { %p1757_p2 = scmp.lt.u32.totalorder %s1755_s8, %s1751_s20  ;;  %p1759_p1 = scmp.lt.u32.totalorder %s1751_s20, %s2203_s27 }
 0x7a5   : > { %p1753_p0 = pnand %p1752_p9, %p2274_p13 }
 0x7a6   : > { %p1758_p12 = por %p1757_p2, %p1756_p11 }
 0x7a7   : > { %p1754_p8 = pneg %p1753_p0 }
 0x7a8   : > { %p1760_p6 = por %p1759_p1, %p1758_p12 }
 0x7aa   : > { %p1761_p10 = pnand %p1760_p6, %p1754_p8 }
 0x7ac   : > { %1764 = shalt.err (!%p1761_p10)
}
 0x7ad   : > { %1498 = dma.vmem_to_hbm [thread:$0]  (%p2274_p13), %s2205_s6, 128, %s2203_s27, %s1156_s19  }
 0x7ae PF: > { %s1181_s28 = sand.u32 1, %s1803_s15   ;;  %p2275_p4 = scmp.ne.s32.totalorder %s2259_s22, 0 }
 0x7af   : > { %p2276_p5 = scmp.ge.s32.totalorder %s1815_s18, 2  ;;  %s1182_s12 = scalar_lea.sflag [#allocation4], %s1181_s28 }
 0x7b1   : > { %p1515_p3 = pnand %p2276_p5, %p2275_p4 }
 0x7b3   : > { %1798 = dma.done.wait (!%p1515_p3), %s1182_s12, 128  }
 0x7b4   : > { %1800 = vsyncadd (!%p1515_p3), %s1182_s12, 4294967168  ;;  %p21_p7 = scmp.ge.s32.totalorder %s1975_s26, 4   ;;  %s2277_s15 = smov %s1807_s16 }
 0x7b5   : > { %s2278_s16 = smov %s1811_s17  ;;  %s2279_s17 = smov %s1991_s14 }
 0x7b6   : > { %s2280_s18 = smov %s1975_s26  ;;  %23 = sbr.rel (!%p21_p7) target bundleno = 8 (0x8), region = 102 }
 0x7bd   :  { %1187 = vsyncpa [#allocation3], 1 }
 0x7be   :  { %1189 = vsyncpa [#allocation3 + $0x1], 1 }
 0x7bf   :  { %1190 = vsyncpa [#allocation6], 1 }
 0x7c0   :  { %1192 = vsyncpa [#allocation6 + $0x1], 1 }
 0x7c1   :  { %1193 = vsyncpa [#allocation9], 1 }
 0x7c2   :  { %1194 = vsyncpa [#allocation4], 1 }
 0x7c3   :  { %1196 = vsyncpa [#allocation4 + $0x1], 1 }

</bundles_post_ra>
